<compile_context>
chip_gen: v7x
topology: tpu7x:2x2x1
jax: 0.10.0
libtpu: 0.0.40
codegen_flags: <defaults>
</compile_context>

<pallas_src>
import functools

import jax
import jax.numpy as jnp
from jax.experimental import pallas as pl
from jax.experimental.pallas import tpu as pltpu


def _round_up(x, m):
    return (x + m - 1) // m * m


def actor_critic_kernel(x_ref, w1_ref, b1_ref, wh_ref, bh_ref, wo_ref, bo_ref,
                        out_ref, *, action_dim):
    x = x_ref[...]

    # shared = ReLU(x @ W1 + b1)                                   (TILE_B, 128)
    shared = jnp.dot(x, w1_ref[...], preferred_element_type=jnp.float32) + b1_ref[...]
    shared = jnp.maximum(shared, 0.0)

    # fused heads stage 1: ReLU(shared @ [wp1|wv1] + [bp1|bv1])    (TILE_B, 128)
    h = jnp.dot(shared, wh_ref[...], preferred_element_type=jnp.float32) + bh_ref[...]
    h = jnp.maximum(h, 0.0)

    # fused heads stage 2: block-diagonal projection straight into the narrow
    # (TILE_B, head_w) output.  Lanes [0:action_dim] = policy pre-activation,
    # lane [action_dim] = value, remaining lanes are exact zeros.
    out = jnp.dot(h, wo_ref[...], preferred_element_type=jnp.float32) + bo_ref[...]

    # Tanh only on the policy lanes; value lane passes through untouched.
    lane = jax.lax.broadcasted_iota(jnp.int32, out.shape, dimension=1)
    out_ref[...] = jnp.where(lane < action_dim, jnp.tanh(out), out)


def _pack_params(params, action_dim, head_w):
    """One-time packing of head weights into fused / block-diagonal form."""
    wh = jnp.concatenate([params["wp1"], params["wv1"]], axis=1)   # (128, 128)
    bh = jnp.concatenate([params["bp1"], params["bv1"]], axis=1)   # (1, 128)

    wo = jnp.zeros((128, head_w), jnp.float32)
    wo = wo.at[:64, :action_dim].set(params["wp2"])                # policy block
    wo = wo.at[64:, action_dim:action_dim + 1].set(params["wv2"])  # value block

    bo = jnp.zeros((1, head_w), jnp.float32)
    bo = bo.at[:, :action_dim].set(params["bp2"])
    bo = bo.at[:, action_dim:action_dim + 1].set(params["bv2"])
    return wh, bh, wo, bo


def _choose_tile_b(batch, tile_b_max):
    """Pick (tile_b, grid_steps).

    tile_b is a multiple of 8, capped by tile_b_max, large enough to amortize the
    ~0.35us per-grid-step overhead, kept to >=8 steps for large batches so the
    v7x megacore can balance the 'parallel' batch axis, and redistributed evenly
    over the chosen step count so padding waste is <8 rows per step.
    """
    batch8 = _round_up(max(int(batch), 1), 8)
    tile = _round_up(min(max(int(tile_b_max), 8), batch8), 8)
    # v7x: keep at least 8 grid steps once the batch is large enough that
    # 512-row tiles still amortize the per-step overhead.
    if batch8 >= 8 * 512:
        tile = min(tile, max(512, _round_up(pl.cdiv(batch8, 8), 8)))
    # Even split over the chosen step count: never increases step count and
    # bounds padding waste (avoids an almost-empty last tile).
    steps = pl.cdiv(batch8, tile)
    tile = _round_up(pl.cdiv(batch8, steps), 8)
    return tile, steps


def actor_critic_forward(x, params, tile_b=4096):
    """x: (batch, obs_dim) float32. Returns (policy (batch, action_dim), value (batch, 1))."""
    batch, obs_dim = x.shape
    action_dim = params["wp2"].shape[1]
    head_w = _round_up(action_dim + 1, 8)      # narrow lane-packed output width

    tile_b, grid_steps = _choose_tile_b(batch, tile_b)
    padded_batch = grid_steps * tile_b
    if padded_batch != batch:
        x = jnp.pad(x, ((0, padded_batch - batch), (0, 0)))

    wh, bh, wo, bo = _pack_params(params, action_dim, head_w)
    w1, b1 = params["w1"], params["b1"]

    kernel = functools.partial(actor_critic_kernel, action_dim=action_dim)
    const = lambda i: (0, 0)   # weights/biases: same block every grid step

    out = pl.pallas_call(
        kernel,
        out_shape=jax.ShapeDtypeStruct((padded_batch, head_w), jnp.float32),
        grid=(grid_steps,),
        in_specs=[
            pl.BlockSpec((tile_b, obs_dim), lambda i: (i, 0)),   # x tile
            pl.BlockSpec(w1.shape, const),                       # W1      (obs_dim, 128)
            pl.BlockSpec(b1.shape, const),                       # b1      (1, 128)
            pl.BlockSpec(wh.shape, const),                       # W_heads (128, 128)
            pl.BlockSpec(bh.shape, const),                       # b_heads (1, 128)
            pl.BlockSpec(wo.shape, const),                       # W_out   (128, head_w)
            pl.BlockSpec(bo.shape, const),                       # b_out   (1, head_w)
        ],
        out_specs=pl.BlockSpec((tile_b, head_w), lambda i: (i, 0)),
        compiler_params=pltpu.CompilerParams(
            dimension_semantics=("parallel",),
            # Generous scoped-VMEM budget (actual use ~<20 MiB at tile_b=4096);
            # safely below physical VMEM on v5e/v6e (128 MiB) and v7x (64 MiB).
            vmem_limit_bytes=40 * 1024 * 1024),
    )(x, w1, b1, wh, bh, wo, bo)

    policy = out[:batch, :action_dim]
    value = out[:batch, action_dim:action_dim + 1]
    return policy, value


def init_params(key, obs_dim, action_dim):
    """Deterministic synthetic init (PyTorch-Linear-style uniform bounds)."""
    def linear(k, fan_in, fan_out):
        kw, kb = jax.random.split(k)
        bound = 1.0 / jnp.sqrt(jnp.float32(fan_in))
        w = jax.random.uniform(kw, (fan_in, fan_out), jnp.float32, -bound, bound)
        b = jax.random.uniform(kb, (1, fan_out), jnp.float32, -bound, bound)
        return w, b

    k1, k2, k3, k4, k5 = jax.random.split(key, 5)
    w1, b1 = linear(k1, obs_dim, 128)
    wp1, bp1 = linear(k2, 128, 64)
    wp2, bp2 = linear(k3, 64, action_dim)
    wv1, bv1 = linear(k4, 128, 64)
    wv2, bv2 = linear(k5, 64, 1)
    return dict(w1=w1, b1=b1, wp1=wp1, bp1=bp1, wp2=wp2, bp2=bp2,
                wv1=wv1, bv1=bv1, wv2=wv2, bv2=bv2)


def reference_forward(x, p):
    shared = jnp.maximum(x @ p["w1"] + p["b1"], 0.0)
    pol = jnp.tanh(jnp.maximum(shared @ p["wp1"] + p["bp1"], 0.0) @ p["wp2"] + p["bp2"])
    val = jnp.maximum(shared @ p["wv1"] + p["bv1"], 0.0) @ p["wv2"] + p["bv2"]
    return pol, val


if __name__ == "__main__":
    obs_dim, action_dim = 16, 4
    key = jax.random.PRNGKey(0)
    kx, kp, kx2, kx3 = jax.random.split(key, 4)

    params = init_params(kp, obs_dim, action_dim)

    # Small batch (single 8-row tile).
    x = jax.random.normal(kx, (2, obs_dim), jnp.float32)
    policy, value = actor_critic_forward(x, params)
    jax.block_until_ready((policy, value))
    ref_policy, ref_value = reference_forward(x, params)
    assert policy.shape == (2, action_dim)
    assert value.shape == (2, 1)
    assert jnp.allclose(policy, ref_policy, atol=1e-5), "policy mismatch"
    assert jnp.allclose(value, ref_value, atol=1e-5), "value mismatch"

    # Multi-step grid + padding path (batch=20, forced 8-row tiles -> 3 steps).
    x2 = jax.random.normal(kx2, (20, obs_dim), jnp.float32)
    policy2, value2 = actor_critic_forward(x2, params, tile_b=8)
    jax.block_until_ready((policy2, value2))
    ref_policy2, ref_value2 = reference_forward(x2, params)
    assert jnp.allclose(policy2, ref_policy2, atol=1e-5), "policy mismatch (tiled)"
    assert jnp.allclose(value2, ref_value2, atol=1e-5), "value mismatch (tiled)"

    # Odd batch with a user tile cap: even-split tiling (1025 rows -> 3 x 344).
    x3 = jax.random.normal(kx3, (1025, obs_dim), jnp.float32)
    policy3, value3 = actor_critic_forward(x3, params, tile_b=512)
    jax.block_until_ready((policy3, value3))
    ref_policy3, ref_value3 = reference_forward(x3, params)
    assert jnp.allclose(policy3, ref_policy3, atol=1e-5), "policy mismatch (padded)"
    assert jnp.allclose(value3, ref_value3, atol=1e-5), "value mismatch (padded)"

    print("KERNEL_OK")
</pallas_src>

<mosaic_0001>
module attributes {stable_mosaic.version = 11 : i64} {
  func.func @actor_critic_kernel(%arg0: i32, %arg1: memref<8x16xf32, #tpu.memory_space<vmem>>, %arg2: memref<16x128xf32, #tpu.memory_space<vmem>>, %arg3: memref<1x128xf32, #tpu.memory_space<vmem>>, %arg4: memref<128x128xf32, #tpu.memory_space<vmem>>, %arg5: memref<1x128xf32, #tpu.memory_space<vmem>>, %arg6: memref<128x8xf32, #tpu.memory_space<vmem>>, %arg7: memref<1x8xf32, #tpu.memory_space<vmem>>, %arg8: memref<8x8xf32, #tpu.memory_space<vmem>>) attributes {dimension_semantics = [#tpu.dimension_semantics<parallel>], iteration_bounds = array<i64: 1>, scalar_prefetch = 0 : i64, scratch_operands = 0 : i64, tpu.core_type = #tpu.core_type<tc>, window_params = [{transform_indices = @transform_0, window_bounds = array<i64: 8, 16>}, {pipeline_mode = #tpu.pipeline_mode<synchronous>, transform_indices = @transform_1, window_bounds = array<i64: 16, 128>}, {pipeline_mode = #tpu.pipeline_mode<synchronous>, transform_indices = @transform_2, window_bounds = array<i64: 1, 128>}, {pipeline_mode = #tpu.pipeline_mode<synchronous>, transform_indices = @transform_3, window_bounds = array<i64: 128, 128>}, {pipeline_mode = #tpu.pipeline_mode<synchronous>, transform_indices = @transform_4, window_bounds = array<i64: 1, 128>}, {pipeline_mode = #tpu.pipeline_mode<synchronous>, transform_indices = @transform_5, window_bounds = array<i64: 128, 8>}, {pipeline_mode = #tpu.pipeline_mode<synchronous>, transform_indices = @transform_6, window_bounds = array<i64: 1, 8>}, {transform_indices = @transform_7, window_bounds = array<i64: 8, 8>}]} {
    %c0 = arith.constant 0 : index
    %c0_0 = arith.constant 0 : index
    %0 = vector.load %arg1[%c0, %c0_0] : memref<8x16xf32, #tpu.memory_space<vmem>>, vector<8x16xf32>
    %c0_1 = arith.constant 0 : index
    %c0_2 = arith.constant 0 : index
    %1 = vector.load %arg2[%c0_1, %c0_2] : memref<16x128xf32, #tpu.memory_space<vmem>>, vector<16x128xf32>
    %cst = arith.constant dense<0.000000e+00> : vector<8x128xf32>
    %2 = tpu.matmul %0, %1, %cst {dimension_numbers = #tpu.dot_dimension_numbers<[1], [0], [0], [1], [0, 0, 1, 1], [], []>} : vector<8x16xf32>, vector<16x128xf32>, vector<8x128xf32> -> vector<8x128xf32>
    %c0_3 = arith.constant 0 : index
    %c0_4 = arith.constant 0 : index
    %3 = vector.load %arg3[%c0_3, %c0_4] : memref<1x128xf32, #tpu.memory_space<vmem>>, vector<1x128xf32>
    %4 = vector.broadcast %3 : vector<1x128xf32> to vector<8x128xf32>
    %5 = arith.addf %2, %4 : vector<8x128xf32>
    %cst_5 = arith.constant 0.000000e+00 : f32
    %6 = vector.broadcast %cst_5 : f32 to vector<8x128xf32>
    %7 = arith.maximumf %5, %6 : vector<8x128xf32>
    %c0_6 = arith.constant 0 : index
    %c0_7 = arith.constant 0 : index
    %8 = vector.load %arg4[%c0_6, %c0_7] : memref<128x128xf32, #tpu.memory_space<vmem>>, vector<128x128xf32>
    %cst_8 = arith.constant dense<0.000000e+00> : vector<8x128xf32>
    %9 = tpu.matmul %7, %8, %cst_8 {dimension_numbers = #tpu.dot_dimension_numbers<[1], [0], [0], [1], [0, 0, 1, 1], [], []>} : vector<8x128xf32>, vector<128x128xf32>, vector<8x128xf32> -> vector<8x128xf32>
    %c0_9 = arith.constant 0 : index
    %c0_10 = arith.constant 0 : index
    %10 = vector.load %arg5[%c0_9, %c0_10] : memref<1x128xf32, #tpu.memory_space<vmem>>, vector<1x128xf32>
    %11 = vector.broadcast %10 : vector<1x128xf32> to vector<8x128xf32>
    %12 = arith.addf %9, %11 : vector<8x128xf32>
    %cst_11 = arith.constant 0.000000e+00 : f32
    %13 = vector.broadcast %cst_11 : f32 to vector<8x128xf32>
    %14 = arith.maximumf %12, %13 : vector<8x128xf32>
    %c0_12 = arith.constant 0 : index
    %c0_13 = arith.constant 0 : index
    %15 = vector.load %arg6[%c0_12, %c0_13] : memref<128x8xf32, #tpu.memory_space<vmem>>, vector<128x8xf32>
    %cst_14 = arith.constant dense<0.000000e+00> : vector<8x8xf32>
    %16 = tpu.matmul %14, %15, %cst_14 {dimension_numbers = #tpu.dot_dimension_numbers<[1], [0], [0], [1], [0, 0, 1, 1], [], []>} : vector<8x128xf32>, vector<128x8xf32>, vector<8x8xf32> -> vector<8x8xf32>
    %c0_15 = arith.constant 0 : index
    %c0_16 = arith.constant 0 : index
    %17 = vector.load %arg7[%c0_15, %c0_16] : memref<1x8xf32, #tpu.memory_space<vmem>>, vector<1x8xf32>
    %18 = vector.broadcast %17 : vector<1x8xf32> to vector<8x8xf32>
    %19 = arith.addf %16, %18 : vector<8x8xf32>
    %20 = tpu.iota {dimensions = array<i32: 1>} : vector<8x8xi32>
    %c4_i32 = arith.constant 4 : i32
    %21 = vector.broadcast %c4_i32 : i32 to vector<8x8xi32>
    %22 = arith.cmpi slt, %20, %21 : vector<8x8xi32>
    %23 = math.tanh %19 : vector<8x8xf32>
    %24 = arith.select %22, %23, %19 : vector<8x8xi1>, vector<8x8xf32>
    %c0_17 = arith.constant 0 : index
    %c0_18 = arith.constant 0 : index
    %25 = vector.load %arg8[%c0_17, %c0_18] : memref<8x8xf32, #tpu.memory_space<vmem>>, vector<8x8xf32>
    tpu.vector_store %arg8[%c0_17, %c0_18], %24 {strides = array<i32>} : memref<8x8xf32, #tpu.memory_space<vmem>>, vector<8x8xf32>,
    return
  }
  func.func @transform_0(%arg0: i32) -> (i32, i32) {
    %c0_i32 = arith.constant 0 : i32
    %c0_i32_0 = arith.constant 0 : i32
    return %arg0, %c0_i32 : i32, i32
  }
  func.func @transform_1(%arg0: i32) -> (i32, i32) {
    %c0_i32 = arith.constant 0 : i32
    %c0_i32_0 = arith.constant 0 : i32
    %c0_i32_1 = arith.constant 0 : i32
    return %c0_i32, %c0_i32_0 : i32, i32
  }
  func.func @transform_2(%arg0: i32) -> (i32, i32) {
    %c0_i32 = arith.constant 0 : i32
    %c0_i32_0 = arith.constant 0 : i32
    %c0_i32_1 = arith.constant 0 : i32
    return %c0_i32, %c0_i32_0 : i32, i32
  }
  func.func @transform_3(%arg0: i32) -> (i32, i32) {
    %c0_i32 = arith.constant 0 : i32
    %c0_i32_0 = arith.constant 0 : i32
    %c0_i32_1 = arith.constant 0 : i32
    return %c0_i32, %c0_i32_0 : i32, i32
  }
  func.func @transform_4(%arg0: i32) -> (i32, i32) {
    %c0_i32 = arith.constant 0 : i32
    %c0_i32_0 = arith.constant 0 : i32
    %c0_i32_1 = arith.constant 0 : i32
    return %c0_i32, %c0_i32_0 : i32, i32
  }
  func.func @transform_5(%arg0: i32) -> (i32, i32) {
    %c0_i32 = arith.constant 0 : i32
    %c0_i32_0 = arith.constant 0 : i32
    %c0_i32_1 = arith.constant 0 : i32
    return %c0_i32, %c0_i32_0 : i32, i32
  }
  func.func @transform_6(%arg0: i32) -> (i32, i32) {
    %c0_i32 = arith.constant 0 : i32
    %c0_i32_0 = arith.constant 0 : i32
    %c0_i32_1 = arith.constant 0 : i32
    return %c0_i32, %c0_i32_0 : i32, i32
  }
  func.func @transform_7(%arg0: i32) -> (i32, i32) {
    %c0_i32 = arith.constant 0 : i32
    %c0_i32_0 = arith.constant 0 : i32
    return %arg0, %c0_i32 : i32, i32
  }
}

</mosaic_0001>

<bundles_post_ra>
// kernel: tpu_custom_call.1
= control target key start
LH: loop header
LB: loop body
LE: loop exit
PB: predicated region body
PF: predicated region fallthrough
CT: control target
= control target key end

     0   :  { %12 = vsyncpa [#allocation3], 0  ;;  %s757_s0 = inlined_call_operand.hbm [shape: f32[8,16], index: 0, kind: input, shape index: {}]   ;;  %s758_s1 = inlined_call_operand.vmem [shape: f32[16,128], index: 1, kind: input, shape index: {}]   ;;  %s759_s2 = inlined_call_operand.vmem [shape: f32[1,128], index: 2, kind: input, shape index: {}]   ;;  %s760_s3 = inlined_call_operand.vmem [shape: f32[128,128], index: 3, kind: input, shape index: {}]   ;;  %s761_s4 = inlined_call_operand.vmem [shape: f32[1,128], index: 4, kind: input, shape index: {}]   ;;  %s762_s5 = inlined_call_operand.vmem [shape: f32[128,8], index: 5, kind: input, shape index: {}]   ;;  %s763_s6 = inlined_call_operand.vmem [shape: f32[1,8], index: 6, kind: input, shape index: {}]   ;;  %s764_s7 = inlined_call_operand.hbm [shape: f32[8,8], index: 7, kind: output, shape index: {}]  }
   0x1   :  { %13 = vsyncpa [#allocation4], 0  ;;  %s557_s24 = smov [#allocation2]   ;;  %s509_s28 = scalar_lea.hbm %s757_s0, 128 }
   0x2   :  { %s20_s25 = sshll.u32 %s557_s24, 4  ;;  %p510_p0 = scmp.ne.s32.totalorder %s757_s0, %s509_s28  ;;  %s21_s25 = int_to_ptr.vmem [resolvable:$true] %s20_s25 }
   0x3   :  { %p513_p1 = scmp.lt.u32.totalorder %s509_s28, %s757_s0 }
   0x5   :  { %p515_p2 = pnand %p513_p1, %p510_p0 }
   0x7   :  { %518 = shalt.err (!%p515_p2)
}
   0x8   :  { %s519_s10 = scalar_lea.vmem %s21_s25, 128  ;;  %p524_p4 = scmp.lt.s32.totalorder %s21_s25, %s21_s25 }
   0x9   :  { %p520_p3 = scmp.ne.s32.totalorder %s21_s25, %s519_s10  ;;  %p525_p5 = scmp.lt.s32.totalorder %s519_s10, %s519_s10 }
   0xb   :  { %p526_p6 = por %p525_p5, %p524_p4 }
   0xd   :  { %p527_p7 = pnand %p526_p6, %p520_p3 }
   0xf   :  { %530 = shalt.err (!%p527_p7)
}
  0x10   :  { %23 = dma.hbm_to_vmem [thread:$0]  %s757_s0, 128, %s21_s25, [#allocation3]  }
  0x11   :  { %553 = dma.done.wait [#allocation3], 128  }
  0x12   :  { %554 = vsyncadd [#allocation3], 4294967168  ;;  %v558_v0 = vmov 0.0|0.0   ;;  %vm559_vm0 = vmmov 0   ;;  %v560_v1 = vmov 0.0   ;;  %v40_v2 = vld [vmem:[%s758_s1] sm:$0xff] }
  0x13   :  { %451 = vmatprep.subr.bf16.mxu0 %v558_v0  ;;  %378 = vmatprep.mubr.msk.f32.mxu0 %vm559_vm0, %v560_v1  ;;  %v41_v3 = vld [vmem:[%s758_s1 + $0x8] sm:$0xff]  ;;  %v124_v5 = vld [vmem:[%s760_s3] sm:$0xff]  ;;  %v126_v7 = vld [vmem:[%s760_s3 + $0x10] sm:$0xff]  ;;  %vm49_vm1 = vcmask 130048   ;;  %vm316_vm3 = vcmask 64512  }
  0x14   :  { %454 = vmatprep.subr.bf16.mxu1 %v558_v0  ;;  %413 = vmatprep.mubr.msk.f32.mxu1 %vm559_vm0, %v560_v1  ;;  %v452_v4 = vpack.c.bf16 %v41_v3, %v40_v2  ;;  %v125_v6 = vld [vmem:[%s760_s3 + $0x8] sm:$0xff]  ;;  %v127_v9 = vld [vmem:[%s760_s3 + $0x18] sm:$0xff]  ;;  %v39_v10 = vld [vmem:[#allocation2] sm:$0xff] }
  0x15   :  { %v455_v8 = vpack.c.bf16 %v125_v6, %v124_v5  ;;  %v458_v11 = vpack.c.bf16 %v127_v9, %v126_v7  ;;  %v128_v12 = vld [vmem:[%s760_s3 + $0x20] sm:$0xff]  ;;  %v129_v13 = vld [vmem:[%s760_s3 + $0x28] sm:$0xff]  ;;  %v130_v15 = vld [vmem:[%s760_s3 + $0x30] sm:$0xff] }
  0x16   :  { %453 = vmatpush3.bf16.msra.mxu0 %v452_v4  ;;  %v461_v14 = vpack.c.bf16 %v129_v13, %v128_v12  ;;  %v131_v16 = vld [vmem:[%s760_s3 + $0x38] sm:$0xff]  ;;  %v132_v18 = vld [vmem:[%s760_s3 + $0x40] sm:$0xff]  ;;  %v133_v19 = vld [vmem:[%s760_s3 + $0x48] sm:$0xff]  ;;  %v311_v4 = vlaneseq }
  0x17   :  { %456 = vmatpush3.bf16.msra.mxu1 %v455_v8  ;;  %478 = vmatprep.subr.bf16.mxu0 %v558_v0  ;;  %v464_v17 = vpack.c.bf16 %v131_v16, %v130_v15  ;;  %v467_v20 = vpack.c.bf16 %v133_v19, %v132_v18  ;;  %v134_v21 = vld [vmem:[%s760_s3 + $0x50] sm:$0xff]  ;;  %v135_v22 = vld [vmem:[%s760_s3 + $0x58] sm:$0xff]  ;;  %v136_v24 = vld [vmem:[%s760_s3 + $0x60] sm:$0xff] }
  0x18   :  { %457 = vmatprep.subr.bf16.mxu1 %v558_v0  ;;  %v470_v23 = vpack.c.bf16 %v135_v22, %v134_v21  ;;  %v137_v25 = vld [vmem:[%s760_s3 + $0x68] sm:$0xff]  ;;  %v138_v27 = vld [vmem:[%s760_s3 + $0x70] sm:$0xff]  ;;  %v139_v28 = vld [vmem:[%s760_s3 + $0x78] sm:$0xff]  ;;  %v312_v5 = vand.u32 127, %v311_v4 }
  0x19   :  { %379 = vmatmul.mubr.msk.f32.vlgmr.msra.gmra.mrb[0].mxu0 %vm49_vm1, %v39_v10  ;;  %v473_v26 = vpack.c.bf16 %v137_v25, %v136_v24  ;;  %v476_v29 = vpack.c.bf16 %v139_v28, %v138_v27  ;;  %v218_v30 = vld [vmem:[%s762_s5] sm:$0xff]  ;;  %v219_v31 = vld [vmem:[%s762_s5 + $0x8] sm:$0xff]  ;;  %v220_v32 = vld [vmem:[%s762_s5 + $0x10] sm:$0xff] }
  0x1a   :  { %448 = vmatprep.mubr.msk.f32.mxu0 %vm559_vm0, %v560_v1  ;;  %v479_v33 = vpack.c.bf16 %v219_v31, %v218_v30  ;;  %v221_v34 = vld [vmem:[%s762_s5 + $0x18] sm:$0xff]  ;;  %v222_v36 = vld [vmem:[%s762_s5 + $0x20] sm:$0xff]  ;;  %v223_v37 = vld [vmem:[%s762_s5 + $0x28] sm:$0xff]  ;;  %vm313_vm2 = vcmp.lt.s32.totalorder %v312_v5, 4 }
  0x1b   :  { %459 = vmatpush3.bf16.msra.mxu1 %v458_v11  ;;  %v482_v35 = vpack.c.bf16 %v221_v34, %v220_v32  ;;  %v485_v38 = vpack.c.bf16 %v223_v37, %v222_v36  ;;  %v224_v39 = vld [vmem:[%s762_s5 + $0x30] sm:$0xff]  ;;  %v225_v40 = vld [vmem:[%s762_s5 + $0x38] sm:$0xff]  ;;  %v226_v42 = vld [vmem:[%s762_s5 + $0x40] sm:$0xff] }
  0x1c   :  { %460 = vmatprep.subr.bf16.mxu1 %v558_v0  ;;  %480 = vmatpush3.bf16.msra.mxu0 %v479_v33  ;;  %v488_v41 = vpack.c.bf16 %v225_v40, %v224_v39  ;;  %v227_v43 = vld [vmem:[%s762_s5 + $0x48] sm:$0xff]  ;;  %v228_v45 = vld [vmem:[%s762_s5 + $0x50] sm:$0xff]  ;;  %v229_v46 = vld [vmem:[%s762_s5 + $0x58] sm:$0xff] }
  0x1d   :  { %481 = vmatprep.subr.bf16.mxu0 %v558_v0  ;;  %v491_v44 = vpack.c.bf16 %v227_v43, %v226_v42  ;;  %v494_v47 = vpack.c.bf16 %v229_v46, %v228_v45  ;;  %v230_v48 = vld [vmem:[%s762_s5 + $0x60] sm:$0xff]  ;;  %v231_v49 = vld [vmem:[%s762_s5 + $0x68] sm:$0xff]  ;;  %v232_v56 = vld [vmem:[%s762_s5 + $0x70] sm:$0xff] }
  0x1e   :  { %v497_v50 = vpack.c.bf16 %v231_v49, %v230_v48  ;;  %v333_v51 = vld [vmem:[%s759_s2] ss:$0 sm:$0xff]  ;;  %v233_v57 = vld [vmem:[%s762_s5 + $0x78] sm:$0xff]  ;;  %s561_s5 = smov [#allocation5]  }
  0x1f   :  { %462 = vmatpush3.bf16.msra.mxu1 %v461_v14  ;;  %v500_v58 = vpack.c.bf16 %v233_v57, %v232_v56  ;;  %v335_v59 = vld [vmem:[%s761_s4] ss:$0 sm:$0xff]  ;;  %s324_s9 = sshll.u32 %s561_s5, 4  ;;  %s325_s9 = int_to_ptr.vmem [resolvable:$true] %s324_s9 }
  0x20   :  { %463 = vmatprep.subr.bf16.mxu1 %v558_v0  ;;  %483 = vmatpush3.bf16.msra.mxu0 %v482_v35  ;;  %s531_s4 = scalar_lea.vmem %s325_s9, 128  ;;  %p536_p9 = scmp.lt.s32.totalorder %s325_s9, %s325_s9 }
  0x21   :  { %484 = vmatprep.subr.bf16.mxu0 %v558_v0  ;;  %p532_p8 = scmp.ne.s32.totalorder %s325_s9, %s531_s4  ;;  %p537_p10 = scmp.lt.s32.totalorder %s531_s4, %s531_s4 }
  0x23   :  { %465 = vmatpush3.bf16.msra.mxu1 %v464_v17  ;;  %p538_p11 = por %p537_p10, %p536_p9 }
  0x24   :  { %466 = vmatprep.subr.bf16.mxu1 %v558_v0  ;;  %486 = vmatpush3.bf16.msra.mxu0 %v485_v38 }
  0x25   :  { %487 = vmatprep.subr.bf16.mxu0 %v558_v0  ;;  %p539_p12 = pnand %p538_p11, %p532_p8 }
  0x27   :  { %468 = vmatpush3.bf16.msra.mxu1 %v467_v20 }
  0x28   :  { %469 = vmatprep.subr.bf16.mxu1 %v558_v0  ;;  %489 = vmatpush3.bf16.msra.mxu0 %v488_v41 }
  0x29   :  { %490 = vmatprep.subr.bf16.mxu0 %v558_v0 }
  0x2b   :  { %471 = vmatpush3.bf16.msra.mxu1 %v470_v23 }
  0x2c   :  { %472 = vmatprep.subr.bf16.mxu1 %v558_v0  ;;  %492 = vmatpush3.bf16.msra.mxu0 %v491_v44 }
  0x2d   :  { %493 = vmatprep.subr.bf16.mxu0 %v558_v0 }
  0x2f   :  { %474 = vmatpush3.bf16.msra.mxu1 %v473_v26 }
  0x30   :  { %475 = vmatprep.subr.bf16.mxu1 %v558_v0  ;;  %495 = vmatpush3.bf16.msra.mxu0 %v494_v47 }
  0x31   :  { %496 = vmatprep.subr.bf16.mxu0 %v558_v0 }
  0x33   :  { %477 = vmatpush3.bf16.msra.mxu1 %v476_v29 }
  0x34   :  { %498 = vmatpush3.bf16.msra.mxu0 %v497_v50 }
  0x35   :  { %499 = vmatprep.subr.bf16.mxu0 %v558_v0  ;;  %v336_v0 = vld [vmem:[%s763_s6] ss:$0 sm:$0xff] }
  0x38   :  { %501 = vmatpush3.bf16.msra.mxu0 %v500_v58 }
  0xec   :  { %v119_v52 = vpop.f32.mrb[0].mxu0 }
  0xed   :  { %v120_v53 = vadd.f32 %v333_v51, %v119_v52  ;;  %v380_v54 = vpop.f32.mrb[1].mxu0 }
  0xef   :  { %v123_v55 = vmax.f32 %v120_v53, 0.0 }
  0xf1   :  { %414 = vmatmul.mubr.f32.vlgmr.msra.gmra.mrb[0].mxu1 %v123_v55 }
 0x1c4   :  { %v213_v60 = vpop.f32.mrb[0].mxu1 }
 0x1c5   :  { %v214_v61 = vadd.f32 %v335_v59, %v213_v60  ;;  %v415_v62 = vpop.f32.mrb[1].mxu1 }
 0x1c7   :  { %v217_v63 = vmax.f32 %v214_v61, 0.0 }
 0x1c9   :  { %449 = vmatmul.mubr.f32.vlgmr.msra.gmra.mrb[2].mxu0 %v217_v63 }
 0x29c   :  { %v307_v1 = vpop.f32.mrb[2].mxu0 }
 0x29d   :  { %v308_v2 = vadd.f32 %v336_v0, %v307_v1  ;;  %v450_v3 = vpop.f32.mrb[3].mxu0 }
 0x29f   :  { %507 = vtanh.f32 %v308_v2 }
 0x2a9   :  { %v508_v6 = vpop.eup %507 }
 0x2aa   :  { %v315_v7 = vsel %vm313_vm2, %v508_v6, %v308_v2 }
 0x2ab   :  { %317 = vst.msk [vmem:[#allocation5] sm:$0xff] %vm316_vm3, %v315_v7 }
 0x2ac   :  { %542 = shalt.err (!%p539_p12)
}
 0x2ad   :  { %s543_s11 = scalar_lea.hbm %s764_s7, 128 }
 0x2ae   :  { %p544_p13 = scmp.ne.s32.totalorder %s764_s7, %s543_s11  ;;  %p547_p0 = scmp.lt.u32.totalorder %s543_s11, %s764_s7 }
 0x2b0   :  { %p549_p1 = pnand %p547_p0, %p544_p13 }
 0x2b2   :  { %552 = shalt.err (!%p549_p1)
}
 0x2b3   :  { %327 = dma.vmem_to_hbm [thread:$0]  %s325_s9, 128, %s764_s7, [#allocation4]  }
 0x2b4   :  { %555 = dma.done.wait [#allocation4], 128  }
 0x2b5   :  { %556 = vsyncadd [#allocation4], 4294967168 }
 0x2b6   :  { %331 = vsyncpa [#allocation3], 1 }
 0x2b7   :  { %332 = vsyncpa [#allocation4], 1 }

</bundles_post_ra>
